<compile_context>
chip_gen: v7x
topology: tpu7x:2x2x1
jax: 0.10.0
libtpu: 0.0.40
codegen_flags: <defaults>
</compile_context>

<pallas_src>
import functools

import jax
import jax.numpy as jnp
from jax import lax
from jax.experimental import pallas as pl
from jax.experimental.pallas import tpu as pltpu


def _round_up(x, m):
    return (x + m - 1) // m * m


def _cdiv(a, b):
    return -(-a // b)


# -----------------------------------------------------------------------------
# Kernel: three lane-dense matmuls  x -> 128 (ReLU) -> 64 (ReLU) -> OUT_pad.
# The branch projection has been folded into the first matmul in the wrapper.
# -----------------------------------------------------------------------------
def trsf_kernel(x_ref, w1_ref, w2_ref, w3_ref, b_ref, o_ref, *, precision):
    x = x_ref[...]                     # [TM, D_in]      (f32 or bf16)
    w1 = w1_ref[...]                   # [D_in, 128]
    w2 = w2_ref[...]                   # [128, 64]
    w3 = w3_ref[...]                   # [64, OUT_pad]
    b_all = b_ref[...]                 # [3, OUT_pad]    f32, packed biases

    b1 = b_all[0:1, : w1.shape[1]]     # [1, 128]
    b2 = b_all[1:2, : w2.shape[1]]     # [1, 64]
    b3 = b_all[2:3, :]                 # [1, OUT_pad]

    # (branch concat + final[0]) folded:  h1 = ReLU(x @ W_eff + b_eff)
    h1 = jnp.maximum(
        jnp.dot(x, w1, preferred_element_type=jnp.float32, precision=precision) + b1,
        0.0)
    h2 = jnp.maximum(
        jnp.dot(h1.astype(w2.dtype), w2, preferred_element_type=jnp.float32,
                precision=precision) + b2,
        0.0)
    # Dropout(p=0.2): identity (inference mode).
    out = jnp.dot(h2.astype(w3.dtype), w3, preferred_element_type=jnp.float32,
                  precision=precision) + b3
    o_ref[...] = out.astype(o_ref.dtype)


def trsf_forward_padded(x, params, *, tm=1024, matmul_dtype=jnp.float32):
    """TRSF forward; returns (padded output [B_pad, OUT_pad] f32, (B, out_dim)).

    The padded slab is returned so the consumer can fuse the row/column slice
    into its own op instead of paying a standalone HBM->HBM copy.
    """
    B, d_in = x.shape
    out_dim = params["w3"].shape[1]
    hi1 = params["w1"].shape[1]        # 128
    hi2 = params["w2"].shape[1]        # 64
    hp = lax.Precision.HIGHEST

    # --- operand packing (wrapper-side, once per call) -----------------------
    w_br = jnp.concatenate(
        [params["w_tn"], params["w_rn"], params["w_sn"], params["w_fc"]], axis=1)
    b_br = jnp.concatenate(
        [params["b_tn"], params["b_rn"], params["b_sn"], params["b_fc"]], axis=1)

    # Fold branch projection into final[0]:
    #   (x @ W_br + b_br) @ W1 + b1  ==  x @ (W_br @ W1) + (b_br @ W1 + b1)
    w_eff = jnp.dot(w_br, params["w1"], precision=hp)                # [D_in, 128]
    b_eff = jnp.dot(b_br, params["w1"], precision=hp) + params["b1"] # [1, 128]

    # Lane-dense output: pad the final projection to a multiple of 128 lanes.
    n_pad = _round_up(max(out_dim, 1), 128)
    w3p = jnp.pad(params["w3"], ((0, 0), (0, n_pad - out_dim)))
    b3p = jnp.pad(params["b3"], ((0, 0), (0, n_pad - out_dim)))

    # Pack all biases into one [3, OUT_pad] operand (fewer DMAs / BlockSpecs).
    bias_pack = jnp.zeros((3, n_pad), jnp.float32)
    bias_pack = bias_pack.at[0, :hi1].set(b_eff[0])
    bias_pack = bias_pack.at[1, :hi2].set(params["b2"][0])
    bias_pack = bias_pack.at[2, :].set(b3p[0])

    # Narrow only the matmul inputs (biases / elementwise path stay f32).
    xq = x.astype(matmul_dtype)
    w1q = w_eff.astype(matmul_dtype)
    w2q = params["w2"].astype(matmul_dtype)
    w3q = w3p.astype(matmul_dtype)

    # --- batch tiling --------------------------------------------------------
    # Single grid step for small/medium batches; even #steps when multi-step
    # so both v7x TensorCores get work under dimension_semantics=("parallel",).
    tm_eff = min(tm, _round_up(B, 8))
    n_steps = _cdiv(B, tm_eff)
    if n_steps > 1 and n_steps % 2 == 1:
        n_steps += 1
        tm_eff = _round_up(_cdiv(B, n_steps), 8)
    b_pad = n_steps * tm_eff
    if b_pad != B:
        xq = jnp.pad(xq, ((0, b_pad - B), (0, 0)))

    const2d = lambda i: (0, 0)  # weights/biases: same block every step -> VMEM-resident

    grid_spec = pltpu.PrefetchScalarGridSpec(
        num_scalar_prefetch=0,
        grid=(n_steps,),
        in_specs=[
            pl.BlockSpec((tm_eff, d_in), lambda i: (i, 0)),   # x tile
            pl.BlockSpec(w1q.shape, const2d),
            pl.BlockSpec(w2q.shape, const2d),
            pl.BlockSpec(w3q.shape, const2d),
            pl.BlockSpec(bias_pack.shape, const2d),
        ],
        out_specs=pl.BlockSpec((tm_eff, n_pad), lambda i: (i, 0)),
    )

    kernel = functools.partial(
        trsf_kernel,
        precision=hp if matmul_dtype == jnp.float32 else None)

    out_padded = pl.pallas_call(
        kernel,
        out_shape=jax.ShapeDtypeStruct((b_pad, n_pad), jnp.float32),
        grid_spec=grid_spec,
        compiler_params=pltpu.CompilerParams(
            dimension_semantics=("parallel",),   # shard batch tiles across TCs (v7x)
            vmem_limit_bytes=32 * 1024 * 1024,
        ),
    )(xq, w1q, w2q, w3q, bias_pack)

    return out_padded, (B, out_dim)


def trsf_forward(x, params, **kwargs):
    """Convenience wrapper: returns the exact [B, out_dim] result."""
    out_padded, (B, out_dim) = trsf_forward_padded(x, params, **kwargs)
    return out_padded[:B, :out_dim]


def init_params(key, d_in, out_dim):
    """Deterministic synthetic parameters matching the module's shapes."""
    ks = jax.random.split(key, 10)

    def lin(kw, fan_in, fan_out):
        scale = 1.0 / jnp.sqrt(jnp.float32(fan_in))
        return jax.random.uniform(kw, (fan_in, fan_out), jnp.float32, -scale, scale)

    return {
        # four branches: D_in -> 64 each (TODO(synk): modeled as linear projections)
        "w_tn": lin(ks[0], d_in, 64), "b_tn": jnp.zeros((1, 64), jnp.float32),
        "w_rn": lin(ks[1], d_in, 64), "b_rn": jnp.zeros((1, 64), jnp.float32),
        "w_sn": lin(ks[2], d_in, 64), "b_sn": jnp.zeros((1, 64), jnp.float32),
        "w_fc": lin(ks[3], d_in, 64), "b_fc": jnp.zeros((1, 64), jnp.float32),
        # final head: 256 -> 128 -> 64 -> out_dim
        "w1": lin(ks[4], 256, 128),
        "b1": jax.random.uniform(ks[5], (1, 128), jnp.float32, -0.05, 0.05),
        "w2": lin(ks[6], 128, 64),
        "b2": jax.random.uniform(ks[7], (1, 64), jnp.float32, -0.05, 0.05),
        "w3": lin(ks[8], 64, out_dim),
        "b3": jax.random.uniform(ks[9], (1, out_dim), jnp.float32, -0.05, 0.05),
    }


def reference_forward(x, p):
    """Pure-JAX reference mirroring the PyTorch module structure (f32, highest)."""
    hp = "highest"
    tn = jnp.dot(x, p["w_tn"], precision=hp) + p["b_tn"]
    rn = jnp.dot(x, p["w_rn"], precision=hp) + p["b_rn"]
    sn = jnp.dot(x, p["w_sn"], precision=hp) + p["b_sn"]
    fc = jnp.dot(x, p["w_fc"], precision=hp) + p["b_fc"]
    cat = jnp.concatenate([tn, rn, sn, fc], axis=1)
    h1 = jnp.maximum(jnp.dot(cat, p["w1"], precision=hp) + p["b1"], 0.0)
    h2 = jnp.maximum(jnp.dot(h1, p["w2"], precision=hp) + p["b2"], 0.0)
    return jnp.dot(h2, p["w3"], precision=hp) + p["b3"]


if __name__ == "__main__":
    key = jax.random.PRNGKey(0)
    k_x1, k_x2, k_x3, k_p = jax.random.split(key, 4)

    B = 8          # batch_size (args[0])
    D_IN = 32      # flattened input_size
    OUT = 16       # output_size

    params = init_params(k_p, D_IN, OUT)

    # 1) Module batch size: single grid step, convenience (sliced) API.
    x_small = jax.random.normal(k_x1, (B, D_IN), dtype=jnp.float32)
    out_small = jax.block_until_ready(trsf_forward(x_small, params))
    ref_small = reference_forward(x_small, params)
    assert out_small.shape == (B, OUT)
    assert jnp.allclose(out_small, ref_small, atol=1e-4, rtol=1e-4)

    # 2) B=200 with the default tm -> ONE grid step (no tm=64 over-tiling);
    #    padded slab returned, slice happens at the consumer (here: the test).
    x_mid = jax.random.normal(k_x2, (200, D_IN), dtype=jnp.float32)
    out_mid_pad, (bm, om) = trsf_forward_padded(x_mid, params)
    jax.block_until_ready(out_mid_pad)
    ref_mid = reference_forward(x_mid, params)
    assert (bm, om) == (200, OUT)
    assert jnp.allclose(out_mid_pad[:bm, :om], ref_mid, atol=1e-4, rtol=1e-4)

    # 3) Larger batch -> multi-step grid rounded to an even number of steps
    #    (exercises batch padding + megacore-parallel path).
    x_big = jax.random.normal(k_x3, (2500, D_IN), dtype=jnp.float32)
    out_big_pad, (bb, ob) = trsf_forward_padded(x_big, params)
    jax.block_until_ready(out_big_pad)
    ref_big = reference_forward(x_big, params)
    assert jnp.allclose(out_big_pad[:bb, :ob], ref_big, atol=1e-4, rtol=1e-4)

    # 4) bf16 matmul-input fast path (v5e/v6e/v7x MXU), f32 accumulate/activations.
    out_bf16_pad, (bf, of) = trsf_forward_padded(
        x_mid, params, matmul_dtype=jnp.bfloat16)
    jax.block_until_ready(out_bf16_pad)
    assert jnp.allclose(out_bf16_pad[:bf, :of], ref_mid, atol=5e-2, rtol=5e-2)

    print("KERNEL_OK")
</pallas_src>

<mosaic_0001>
module attributes {stable_mosaic.version = 11 : i64} {
  func.func @trsf_kernel(%arg0: i32, %arg1: memref<8x32xf32, #tpu.memory_space<vmem>>, %arg2: memref<32x128xf32, #tpu.memory_space<vmem>>, %arg3: memref<128x64xf32, #tpu.memory_space<vmem>>, %arg4: memref<64x128xf32, #tpu.memory_space<vmem>>, %arg5: memref<3x128xf32, #tpu.memory_space<vmem>>, %arg6: memref<8x128xf32, #tpu.memory_space<vmem>>) attributes {dimension_semantics = [#tpu.dimension_semantics<parallel>], iteration_bounds = array<i64: 1>, scalar_prefetch = 0 : i64, scratch_operands = 0 : i64, tpu.core_type = #tpu.core_type<tc>, window_params = [{transform_indices = @transform_0, window_bounds = array<i64: 8, 32>}, {pipeline_mode = #tpu.pipeline_mode<synchronous>, transform_indices = @transform_1, window_bounds = array<i64: 32, 128>}, {pipeline_mode = #tpu.pipeline_mode<synchronous>, transform_indices = @transform_2, window_bounds = array<i64: 128, 64>}, {pipeline_mode = #tpu.pipeline_mode<synchronous>, transform_indices = @transform_3, window_bounds = array<i64: 64, 128>}, {pipeline_mode = #tpu.pipeline_mode<synchronous>, transform_indices = @transform_4, window_bounds = array<i64: 3, 128>}, {transform_indices = @transform_5, window_bounds = array<i64: 8, 128>}]} {
    %c0 = arith.constant 0 : index
    %c0_0 = arith.constant 0 : index
    %0 = vector.load %arg1[%c0, %c0_0] : memref<8x32xf32, #tpu.memory_space<vmem>>, vector<8x32xf32>
    %c0_1 = arith.constant 0 : index
    %c0_2 = arith.constant 0 : index
    %1 = vector.load %arg2[%c0_1, %c0_2] : memref<32x128xf32, #tpu.memory_space<vmem>>, vector<32x128xf32>
    %c0_3 = arith.constant 0 : index
    %c0_4 = arith.constant 0 : index
    %2 = vector.load %arg3[%c0_3, %c0_4] : memref<128x64xf32, #tpu.memory_space<vmem>>, vector<128x64xf32>
    %c0_5 = arith.constant 0 : index
    %c0_6 = arith.constant 0 : index
    %3 = vector.load %arg4[%c0_5, %c0_6] : memref<64x128xf32, #tpu.memory_space<vmem>>, vector<64x128xf32>
    %c0_7 = arith.constant 0 : index
    %c0_8 = arith.constant 0 : index
    %4 = vector.load %arg5[%c0_7, %c0_8] : memref<3x128xf32, #tpu.memory_space<vmem>>, vector<3x128xf32>
    %5 = vector.extract_strided_slice %4 {offsets = [0, 0], sizes = [1, 128], strides = [1, 1]} : vector<3x128xf32> to vector<1x128xf32>
    %6 = vector.extract_strided_slice %4 {offsets = [1, 0], sizes = [1, 64], strides = [1, 1]} : vector<3x128xf32> to vector<1x64xf32>
    %7 = vector.extract_strided_slice %4 {offsets = [2, 0], sizes = [1, 128], strides = [1, 1]} : vector<3x128xf32> to vector<1x128xf32>
    %cst = arith.constant dense<0.000000e+00> : vector<8x128xf32>
    %8 = tpu.matmul %0, %1, %cst {dimension_numbers = #tpu.dot_dimension_numbers<[1], [0], [0], [1], [0, 0, 1, 1], [], []>, precision = #tpu.contract_precision<fp32>} : vector<8x32xf32>, vector<32x128xf32>, vector<8x128xf32> -> vector<8x128xf32>
    %9 = vector.broadcast %5 : vector<1x128xf32> to vector<8x128xf32>
    %10 = arith.addf %8, %9 : vector<8x128xf32>
    %cst_9 = arith.constant 0.000000e+00 : f32
    %11 = vector.broadcast %cst_9 : f32 to vector<8x128xf32>
    %12 = arith.maximumf %10, %11 : vector<8x128xf32>
    %cst_10 = arith.constant dense<0.000000e+00> : vector<8x64xf32>
    %13 = tpu.matmul %12, %2, %cst_10 {dimension_numbers = #tpu.dot_dimension_numbers<[1], [0], [0], [1], [0, 0, 1, 1], [], []>, precision = #tpu.contract_precision<fp32>} : vector<8x128xf32>, vector<128x64xf32>, vector<8x64xf32> -> vector<8x64xf32>
    %14 = vector.broadcast %6 : vector<1x64xf32> to vector<8x64xf32>
    %15 = arith.addf %13, %14 : vector<8x64xf32>
    %cst_11 = arith.constant 0.000000e+00 : f32
    %16 = vector.broadcast %cst_11 : f32 to vector<8x64xf32>
    %17 = arith.maximumf %15, %16 : vector<8x64xf32>
    %cst_12 = arith.constant dense<0.000000e+00> : vector<8x128xf32>
    %18 = tpu.matmul %17, %3, %cst_12 {dimension_numbers = #tpu.dot_dimension_numbers<[1], [0], [0], [1], [0, 0, 1, 1], [], []>, precision = #tpu.contract_precision<fp32>} : vector<8x64xf32>, vector<64x128xf32>, vector<8x128xf32> -> vector<8x128xf32>
    %19 = vector.broadcast %7 : vector<1x128xf32> to vector<8x128xf32>
    %20 = arith.addf %18, %19 : vector<8x128xf32>
    %c0_13 = arith.constant 0 : index
    %c0_14 = arith.constant 0 : index
    %21 = vector.load %arg6[%c0_13, %c0_14] : memref<8x128xf32, #tpu.memory_space<vmem>>, vector<8x128xf32>
    tpu.vector_store %arg6[%c0_13, %c0_14], %20 {strides = array<i32>} : memref<8x128xf32, #tpu.memory_space<vmem>>, vector<8x128xf32>,
    return
  }
  func.func @transform_0(%arg0: i32) -> (i32, i32) {
    %c0_i32 = arith.constant 0 : i32
    %c0_i32_0 = arith.constant 0 : i32
    return %arg0, %c0_i32 : i32, i32
  }
  func.func @transform_1(%arg0: i32) -> (i32, i32) {
    %c0_i32 = arith.constant 0 : i32
    %c0_i32_0 = arith.constant 0 : i32
    %c0_i32_1 = arith.constant 0 : i32
    return %c0_i32, %c0_i32_0 : i32, i32
  }
  func.func @transform_2(%arg0: i32) -> (i32, i32) {
    %c0_i32 = arith.constant 0 : i32
    %c0_i32_0 = arith.constant 0 : i32
    %c0_i32_1 = arith.constant 0 : i32
    return %c0_i32, %c0_i32_0 : i32, i32
  }
  func.func @transform_3(%arg0: i32) -> (i32, i32) {
    %c0_i32 = arith.constant 0 : i32
    %c0_i32_0 = arith.constant 0 : i32
    %c0_i32_1 = arith.constant 0 : i32
    return %c0_i32, %c0_i32_0 : i32, i32
  }
  func.func @transform_4(%arg0: i32) -> (i32, i32) {
    %c0_i32 = arith.constant 0 : i32
    %c0_i32_0 = arith.constant 0 : i32
    %c0_i32_1 = arith.constant 0 : i32
    return %c0_i32, %c0_i32_0 : i32, i32
  }
  func.func @transform_5(%arg0: i32) -> (i32, i32) {
    %c0_i32 = arith.constant 0 : i32
    %c0_i32_0 = arith.constant 0 : i32
    return %arg0, %c0_i32 : i32, i32
  }
}

</mosaic_0001>

<bundles_post_ra>
// kernel: tpu_custom_call.1
= control target key start
LH: loop header
LB: loop body
LE: loop exit
PB: predicated region body
PF: predicated region fallthrough
CT: control target
= control target key end

     0   :  { %v2638_v3 = vmov 0.0|0.0   ;;  %vm2639_vm0 = vmmov 0   ;;  %v2640_v8 = vmov 0.0   ;;  %vm55_vm1 = vcmask 261120   ;;  %s3311_s0 = inlined_call_operand.vmem [shape: f32[8,32], index: 0, kind: input, shape index: {}]   ;;  %s3312_s1 = inlined_call_operand.vmem [shape: f32[32,128], index: 1, kind: input, shape index: {}]   ;;  %s3313_s2 = inlined_call_operand.vmem [shape: f32[128,64], index: 2, kind: input, shape index: {}]   ;;  %s3314_s3 = inlined_call_operand.vmem [shape: f32[64,128], index: 3, kind: input, shape index: {}]   ;;  %s3315_s4 = inlined_call_operand.vmem [shape: f32[3,128], index: 4, kind: input, shape index: {}]   ;;  %s3316_s5 = inlined_call_operand.hbm [shape: f32[8,128], index: 5, kind: output, shape index: {}]  }
   0x1   :  { %v22_v0 = vld [vmem:[%s3312_s1] sm:$0xff]  ;;  %v23_v1 = vld [vmem:[%s3312_s1 + $0x8] sm:$0xff]  ;;  %v24_v2 = vld [vmem:[%s3312_s1 + $0x10] sm:$0xff]  ;;  %2333 = vmatprep.subr.bf16.mxu0 %v2638_v3  ;;  %1956 = vmatprep.mubr.msk.f32.mxu0 %vm2639_vm0, %v2640_v8 }
   0x2   :  { %v60_v4 = vand.u32 4294901760, %v22_v0  ;;  %v63_v5 = vand.u32 4294901760, %v23_v1  ;;  %v25_v6 = vld [vmem:[%s3312_s1 + $0x18] sm:$0xff]  ;;  %v66_v7 = vand.u32 4294901760, %v24_v2  ;;  %v21_v9 = vld [vmem:[%s3311_s0] sm:$0xff]  ;;  %2327 = vmatprep.subr.bf16.mxu1 %v2638_v3  ;;  %1945 = vmatprep.mubr.msk.f32.mxu1 %vm2639_vm0, %v2640_v8  ;;  %v2707_v16 = vld [vmem:[%s3313_s2 + $0x8] sm:$0xff] }
   0x3   :  { %v69_v10 = vand.u32 4294901760, %v25_v6  ;;  %v57_v11 = vsel %vm55_vm1, %v21_v9, 0  ;;  %v2696_v12 = vld [vmem:[%s3313_s2] sm:$0xff]  ;;  %v553_v26 = vand.u32 4294901760, %v2707_v16 }
   0x4   :  { %v2698_v13 = vsub.f32 %v22_v0, %v60_v4  ;;  %v2700_v14 = vsub.f32 %v23_v1, %v63_v5  ;;  %v2702_v15 = vsub.f32 %v24_v2, %v66_v7  ;;  %v2711_v18 = vand.u32 4294901760, %v57_v11 }
   0x5   :  { %v2709_v17 = vsub.f32 %v25_v6, %v69_v10  ;;  %v2713_v19 = vpack.c.bf16 %v63_v5, %v60_v4  ;;  %v550_v20 = vand.u32 4294901760, %v2696_v12 }
   0x6   :  { %v141_v21 = vand.u32 4294901760, %v2698_v13  ;;  %v148_v22 = vand.u32 4294901760, %v2700_v14  ;;  %v155_v23 = vand.u32 4294901760, %v2702_v15  ;;  %v2721_v25 = vsub.f32 %v57_v11, %v2711_v18 }
   0x7   :  { %v162_v24 = vand.u32 4294901760, %v2709_v17  ;;  %2329 = vmatpush3.bf16.msra.mxu1 %v2713_v19 }
   0x8   :  { %10 = vsyncpa [#allocation3], 0  ;;  %v142_v27 = vsub.f32 %v2698_v13, %v141_v21  ;;  %v149_v28 = vsub.f32 %v2700_v14, %v148_v22  ;;  %v156_v29 = vsub.f32 %v2702_v15, %v155_v23  ;;  %2330 = vmatprep.subr.bf16.mxu1 %v2638_v3  ;;  %v2738_v30 = vld [vmem:[%s3313_s2 + $0x10] sm:$0xff]  ;;  %v2743_v32 = vpack.c.bf16 %v69_v10, %v66_v7  ;;  %v2754_v35 = vld [vmem:[%s3313_s2 + $0x18] sm:$0xff] }
   0x9   :  { %v163_v31 = vsub.f32 %v2709_v17, %v162_v24  ;;  %v130_v33 = vand.u32 4294901760, %v2721_v25  ;;  %v2749_v34 = vsub.f32 %v2696_v12, %v550_v20  ;;  %v2759_v36 = vld [vmem:[%s3313_s2 + $0x20] sm:$0xff]  ;;  %v2764_v40 = vsub.f32 %v2707_v16, %v553_v26  ;;  %v2775_v45 = vld [vmem:[%s3313_s2 + $0x28] sm:$0xff]  ;;  %v2784_v50 = vld [vmem:[%s3313_s2 + $0x30] sm:$0xff] }
   0xa   :  { %v143_v37 = vand.u32 4294901760, %v142_v27  ;;  %v150_v38 = vand.u32 4294901760, %v149_v28  ;;  %v157_v39 = vand.u32 4294901760, %v156_v29  ;;  %v556_v44 = vand.u32 4294901760, %v2738_v30  ;;  %v2811_v59 = vld [vmem:[%s3313_s2 + $0x38] sm:$0xff]  ;;  %v2826_v4 = vld [vmem:[%s3313_s2 + $0x40] sm:$0xff] }
   0xb   :  { %v164_v41 = vand.u32 4294901760, %v163_v31  ;;  %2332 = vmatpush3.bf16.msra.mxu1 %v2743_v32  ;;  %v131_v42 = vsub.f32 %v2721_v25, %v130_v33  ;;  %v3325_v43 = vand.u32 4294901760, %v2749_v34  ;;  %v3323_v47 = vand.u32 4294901760, %v2764_v40  ;;  %v2844_v10 = vld [vmem:[%s3313_s2 + $0x48] sm:$0xff]  ;;  %v38_v16 = vld [vmem:[%s3313_s2 + $0x60] sm:$0xff] }
   0xc   :  { %v2334_v46 = vpack.c.bf16 %v150_v38, %v143_v37  ;;  %2387 = vmatprep.subr.bf16.mxu1 %v2638_v3  ;;  %v559_v48 = vand.u32 4294901760, %v2754_v35  ;;  %v562_v49 = vand.u32 4294901760, %v2759_v36  ;;  %v2792_v54 = vsub.f32 %v2738_v30, %v556_v44 }
   0xd   :  { %v2337_v51 = vpack.c.bf16 %v164_v41, %v157_v39  ;;  %v132_v52 = vand.u32 4294901760, %v131_v42  ;;  %v644_v53 = vsub.f32 %v2749_v34, %v3325_v43  ;;  %v651_v55 = vsub.f32 %v2764_v40, %v3323_v47  ;;  %v2864_v41 = vld [vmem:[%s3313_s2 + $0x50] sm:$0xff] }
   0xe   :  { %2335 = vmatpush3.bf16.msra.mxu0 %v2334_v46  ;;  %v2800_v56 = vsub.f32 %v2754_v35, %v559_v48  ;;  %v565_v57 = vand.u32 4294901760, %v2775_v45  ;;  %v2806_v58 = vsub.f32 %v2759_v36, %v562_v49  ;;  %v3321_v61 = vand.u32 4294901760, %v2792_v54  ;;  %v41_v35 = vld [vmem:[%s3313_s2 + $0x78] sm:$0xff] }
   0xf   :  { %2336 = vmatprep.subr.bf16.mxu0 %v2638_v3  ;;  %1946 = vmatmul.mubr.f32.vlgmr.msra.gmra.mrb[0].mxu1 %v132_v52  ;;  %v645_v60 = vand.u32 4294901760, %v644_v53  ;;  %v568_v62 = vand.u32 4294901760, %v2784_v50  ;;  %v652_v63 = vand.u32 4294901760, %v651_v55  ;;  %v2340_v5 = vpack.c.bf16 %v2700_v14, %v2698_v13  ;;  %v2873_v53 = vld [vmem:[%s3313_s2 + $0x58] sm:$0xff] }
  0x10   :  { %v3320_v0 = vand.u32 4294901760, %v2800_v56  ;;  %v3319_v1 = vand.u32 4294901760, %v2806_v58  ;;  %v2821_v2 = vsub.f32 %v2775_v45, %v565_v57  ;;  %2070 = vmatprep.mubr.msk.f32.mxu1 %vm2639_vm0, %v2640_v8  ;;  %v658_v6 = vsub.f32 %v2792_v54, %v3321_v61 }
  0x11   :  { %v571_v7 = vand.u32 4294901760, %v2811_v59  ;;  %v2839_v9 = vsub.f32 %v2784_v50, %v568_v62  ;;  %v2388_v11 = vpack.c.bf16 %v652_v63, %v645_v60  ;;  %v574_v39 = vand.u32 4294901760, %v2826_v4 }
  0x12   :  { %2338 = vmatpush3.bf16.msra.mxu0 %v2337_v51  ;;  %v665_v27 = vsub.f32 %v2800_v56, %v3320_v0  ;;  %v672_v28 = vsub.f32 %v2806_v58, %v3319_v1  ;;  %v3318_v29 = vand.u32 4294901760, %v2821_v2  ;;  %v659_v31 = vand.u32 4294901760, %v658_v6 }
  0x13   :  { %2339 = vmatprep.subr.bf16.mxu0 %v2638_v3  ;;  %v3317_v37 = vand.u32 4294901760, %v2839_v9  ;;  %v2858_v38 = vsub.f32 %v2811_v59, %v571_v7  ;;  %2389 = vmatpush3.bf16.msra.mxu1 %v2388_v11  ;;  %v577_v52 = vand.u32 4294901760, %v2844_v10  ;;  %v2343_v55 = vpack.c.bf16 %v2709_v17, %v2702_v15  ;;  %v39_v17 = vld [vmem:[%s3313_s2 + $0x68] sm:$0xff] }
  0x14   :  { %v666_v42 = vand.u32 4294901760, %v665_v27  ;;  %v673_v46 = vand.u32 4294901760, %v672_v28  ;;  %v679_v51 = vsub.f32 %v2821_v2, %v3318_v29  ;;  %2390 = vmatprep.subr.bf16.mxu1 %v2638_v3  ;;  %v2886_v6 = vsub.f32 %v2826_v4, %v574_v39 }
  0x15   :  { %1957 = vmatmul.mubr.f32.vlgmr.msra.gmra.mrb[0].mxu0 %v2711_v18  ;;  %v686_v60 = vsub.f32 %v2839_v9, %v3317_v37  ;;  %v3322_v63 = vand.u32 4294901760, %v2858_v38  ;;  %v2893_v28 = vsub.f32 %v2844_v10, %v577_v52  ;;  %v580_v37 = vand.u32 4294901760, %v2864_v41 }
  0x16   :  { %2341 = vmatpush3.bf16.msra.mxu0 %v2340_v5  ;;  %1967 = vmatprep.mubr.msk.f32.mxu0 %vm2639_vm0, %v2640_v8  ;;  %v2391_v11 = vpack.c.bf16 %v666_v42, %v659_v31  ;;  %v680_v27 = vand.u32 4294901760, %v679_v51  ;;  %v3324_v5 = vand.u32 4294901760, %v2886_v6  ;;  %v583_v1 = vand.u32 4294901760, %v2873_v53 }
  0x17   :  { %2342 = vmatprep.subr.bf16.mxu0 %v2638_v3  ;;  %v693_v29 = vsub.f32 %v2858_v38, %v3322_v63  ;;  %v687_v42 = vand.u32 4294901760, %v686_v60  ;;  %v706_v51 = vand.u32 4294901760, %v2893_v28  ;;  %v2906_v0 = vsub.f32 %v2864_v41, %v580_v37 }
  0x18   :  { %2392 = vmatpush3.bf16.msra.mxu1 %v2391_v11  ;;  %v2394_v31 = vpack.c.bf16 %v680_v27, %v673_v46  ;;  %v700_v63 = vsub.f32 %v2886_v6, %v3324_v5  ;;  %v2915_v11 = vsub.f32 %v2873_v53, %v583_v1  ;;  %v2964_v13 = vpack.c.bf16 %v553_v26, %v550_v20 }
  0x19   :  { %2393 = vmatprep.subr.bf16.mxu1 %v2638_v3  ;;  %v694_v61 = vand.u32 4294901760, %v693_v29  ;;  %v707_v46 = vsub.f32 %v2893_v28, %v706_v51  ;;  %v713_v60 = vand.u32 4294901760, %v2906_v0  ;;  %v2973_v14 = vpack.c.bf16 %v559_v48, %v556_v44 }
  0x1a   :  { %2344 = vmatpush3.bf16.msra.mxu0 %v2343_v55  ;;  %v720_v29 = vand.u32 4294901760, %v2915_v11  ;;  %v701_v47 = vand.u32 4294901760, %v700_v63  ;;  %v2983_v12 = vpack.c.bf16 %v565_v57, %v562_v49  ;;  %v2991_v15 = vpack.c.bf16 %v571_v7, %v568_v62 }
  0x1b   :  { %2345 = vmatprep.subr.bf16.mxu0 %v2638_v3  ;;  %v2397_v27 = vpack.c.bf16 %v694_v61, %v687_v42  ;;  %v708_v5 = vand.u32 4294901760, %v707_v46  ;;  %v714_v43 = vsub.f32 %v2906_v0, %v713_v60  ;;  %v2352_v42 = vpack.c.bf16 %v148_v22, %v141_v21 }
  0x1c   :  { %2395 = vmatpush3.bf16.msra.mxu1 %v2394_v31  ;;  %v721_v55 = vsub.f32 %v2915_v11, %v720_v29  ;;  %v595_v44 = vand.u32 4294901760, %v41_v35  ;;  %v3037_v59 = vpack.c.bf16 %v577_v52, %v574_v39  ;;  %v51_v52 = vlaneseq }
  0x1d   :  { %1968 = vmatmul.mubr.f32.vlgmr.msra.gmra.mrb[0].mxu0 %v2721_v25  ;;  %2396 = vmatprep.subr.bf16.mxu1 %v2638_v3  ;;  %v2400_v61 = vpack.c.bf16 %v708_v5, %v701_v47  ;;  %v715_v63 = vand.u32 4294901760, %v714_v43  ;;  %v2355_v43 = vpack.c.bf16 %v162_v24, %v155_v23  ;;  %vm1195_vm2 = vcmask 523264  }
  0x1e   :  { %2347 = vmatpush3.bf16.msra.mxu0 %v2713_v19  ;;  %1978 = vmatprep.mubr.msk.f32.mxu0 %vm2639_vm0, %v2640_v8  ;;  %v722_v31 = vand.u32 4294901760, %v721_v55  ;;  %v3023_v47 = vsub.f32 %v41_v35, %v595_v44  ;;  %v3062_v53 = vshrl.u32 %v51_v52, 7  ;;  %v2424_v35 = vpack.c.bf16 %v2893_v28, %v2886_v6 }
  0x1f   :  { %2348 = vmatprep.subr.bf16.mxu0 %v2638_v3 }
  0x20   :  { %2398 = vmatpush3.bf16.msra.mxu1 %v2397_v27  ;;  %v2403_v46 = vpack.c.bf16 %v722_v31, %v715_v63  ;;  %v748_v49 = vand.u32 4294901760, %v3023_v47  ;;  %v3045_v27 = vpack.c.bf16 %v583_v1, %v580_v37  ;;  %v53_v55 = vsub.s32 0, %v3062_v53 }
  0x21   :  { %2399 = vmatprep.subr.bf16.mxu1 %v2638_v3 }
  0x22   :  { %2350 = vmatpush3.bf16.msra.mxu0 %v2743_v32  ;;  %v749_v57 = vsub.f32 %v3023_v47, %v748_v49 }
  0x23   :  { %2351 = vmatprep.subr.bf16.mxu0 %v2638_v3 }
  0x24   :  { %2401 = vmatpush3.bf16.msra.mxu1 %v2400_v61  ;;  %v750_v7 = vand.u32 4294901760, %v749_v57  ;;  %v3068_v61 = vld [vmem:[%s3315_s4] sm:$0x7] }
  0x25   :  { %1979 = vmatmul.mubr.f32.vlgmr.msra.gmra.mrb[0].mxu0 %v130_v33  ;;  %2402 = vmatprep.subr.bf16.mxu1 %v2638_v3  ;;  %v40_v33 = vld [vmem:[%s3313_s2 + $0x70] sm:$0xff]  ;;  %v54_v63 = vrot.slane %v3068_v61, %v53_v55 }
  0x26   :  { %2353 = vmatpush3.bf16.msra.mxu0 %v2352_v42  ;;  %1989 = vmatprep.mubr.msk.f32.mxu0 %vm2639_vm0, %v2640_v8  ;;  %v592_v36 = vand.u32 4294901760, %v40_v33 }
  0x27   :  { %2354 = vmatprep.subr.bf16.mxu0 %v2638_v3 }
  0x28   :  { %2404 = vmatpush3.bf16.msra.mxu1 %v2403_v46  ;;  %v3021_v45 = vsub.f32 %v40_v33, %v592_v36  ;;  %v3054_v10 = vpack.c.bf16 %v595_v44, %v592_v36  ;;  %v2421_v33 = vpack.c.bf16 %v2858_v38, %v2839_v9  ;;  %v2427_v36 = vpack.c.bf16 %v2915_v11, %v2906_v0  ;;  %v42_v0 = vld [vmem:[%s3314_s3] sm:$0xff]  ;;  %v44_v11 = vld [vmem:[%s3314_s3 + $0x10] sm:$0xff] }
  0x29   :  { %2405 = vmatprep.subr.bf16.mxu1 %v2638_v3  ;;  %v3326_v44 = vand.u32 4294901760, %v2749_v34 }
  0x2a   :  { %2356 = vmatpush3.bf16.msra.mxu0 %v2355_v43  ;;  %v741_v48 = vand.u32 4294901760, %v3021_v45  ;;  %v2433_v37 = vpack.c.bf16 %v3023_v47, %v3021_v45  ;;  %v48_v47 = vld [vmem:[%s3314_s3 + $0x30] sm:$0xff] }
  0x2b   :  { %2357 = vmatprep.subr.bf16.mxu0 %v2638_v3 }
  0x2c   :  { %v742_v50 = vsub.f32 %v3021_v45, %v741_v48 }
  0x2d   :  { %1990 = vmatmul.mubr.f32.vlgmr.msra.gmra.mrb[0].mxu0 %v2711_v18 }
  0x2e   :  { %2359 = vmatpush3.bf16.msra.mxu0 %v2713_v19  ;;  %2000 = vmatprep.mubr.msk.f32.mxu0 %vm2639_vm0, %v2640_v8  ;;  %v589_v19 = vand.u32 4294901760, %v39_v17  ;;  %v743_v62 = vand.u32 4294901760, %v742_v50  ;;  %v3327_v50 = vand.u32 4294901760, %v2764_v40 }
  0x2f   :  { %2360 = vmatprep.subr.bf16.mxu0 %v2638_v3 }
  0x30   :  { %v3004_v21 = vsub.f32 %v39_v17, %v589_v19  ;;  %v2409_v5 = vpack.c.bf16 %v750_v7, %v743_v62  ;;  %v2412_v17 = vpack.c.bf16 %v2764_v40, %v2749_v34  ;;  %v2460_v57 = vpack.c.bf16 %v3327_v50, %v3326_v44 }
  0x31   :  { %v3328_v62 = vand.u32 4294901760, %v2792_v54  ;;  %v3329_v7 = vand.u32 4294901760, %v2800_v56  ;;  %v3330_v34 = vand.u32 4294901760, %v2806_v58  ;;  %v3331_v40 = vand.u32 4294901760, %v2821_v2 }
  0x32   :  { %2362 = vmatpush3.bf16.msra.mxu0 %v2743_v32  ;;  %v734_v23 = vand.u32 4294901760, %v3004_v21 }
  0x33   :  { %2363 = vmatprep.subr.bf16.mxu0 %v2638_v3 }
  0x34   :  { %v735_v25 = vsub.f32 %v3004_v21, %v734_v23 }
  0x35   :  { %2001 = vmatmul.mubr.f32.vlgmr.msra.gmra.mrb[0].mxu0 %v2711_v18  ;;  %v586_v18 = vand.u32 4294901760, %v38_v16 }
  0x36   :  { %2365 = vmatpush3.bf16.msra.mxu0 %v2964_v13  ;;  %2035 = vmatprep.mubr.msk.f32.mxu0 %vm2639_vm0, %v2640_v8  ;;  %v736_v30 = vand.u32 4294901760, %v735_v25 }
  0x37   :  { %2366 = vmatprep.subr.bf16.mxu0 %v2638_v3  ;;  %v3002_v20 = vsub.f32 %v38_v16, %v586_v18  ;;  %v3050_v4 = vpack.c.bf16 %v589_v19, %v586_v18 }
  0x39   :  { %v727_v22 = vand.u32 4294901760, %v3002_v20  ;;  %v2430_v1 = vpack.c.bf16 %v3004_v21, %v3002_v20 }
  0x3a   :  { %2368 = vmatpush3.bf16.msra.mxu0 %v2973_v14 }
  0x3b   :  { %2369 = vmatprep.subr.bf16.mxu0 %v2638_v3  ;;  %v728_v24 = vsub.f32 %v3002_v20, %v727_v22 }
  0x3d   :  { %v729_v26 = vand.u32 4294901760, %v728_v24  ;;  %v2415_v24 = vpack.c.bf16 %v2800_v56, %v2792_v54  ;;  %v3333_v54 = vand.u32 4294901760, %v2858_v38  ;;  %v43_v38 = vld [vmem:[%s3314_s3 + $0x8] sm:$0xff] }
  0x3e   :  { %2371 = vmatpush3.bf16.msra.mxu0 %v2983_v12  ;;  %v1203_v28 = vand.u32 4294901760, %v43_v38 }
  0x3f   :  { %2372 = vmatprep.subr.bf16.mxu0 %v2638_v3  ;;  %v2406_v32 = vpack.c.bf16 %v736_v30, %v729_v26  ;;  %v2418_v30 = vpack.c.bf16 %v2821_v2, %v2806_v58  ;;  %v2475_v58 = vpack.c.bf16 %v720_v29, %v713_v60  ;;  %v2478_v2 = vpack.c.bf16 %v734_v23, %v727_v22  ;;  %v45_v60 = vld [vmem:[%s3314_s3 + $0x18] sm:$0xff] }
  0x40   :  { %v1206_v29 = vand.u32 4294901760, %v44_v11  ;;  %v3206_v23 = vsub.f32 %v43_v38, %v1203_v28 }
  0x41   :  { %2407 = vmatpush3.bf16.msra.mxu1 %v2406_v32 }
  0x42   :  { %2374 = vmatpush3.bf16.msra.mxu0 %v2991_v15  ;;  %2408 = vmatprep.subr.bf16.mxu1 %v2638_v3  ;;  %v3220_v55 = vsub.f32 %v44_v11, %v1206_v29 }
  0x43   :  { %2375 = vmatprep.subr.bf16.mxu0 %v2638_v3 }
  0x45   :  { %2410 = vmatpush3.bf16.msra.mxu1 %v2409_v5  ;;  %v2463_v5 = vpack.c.bf16 %v3329_v7, %v3328_v62 }
  0x46   :  { %2377 = vmatpush3.bf16.msra.mxu0 %v3037_v59  ;;  %2411 = vmatprep.subr.bf16.mxu1 %v2638_v3 }
  0x47   :  { %2378 = vmatprep.subr.bf16.mxu0 %v2638_v3 }
  0x4a   :  { %2380 = vmatpush3.bf16.msra.mxu0 %v3045_v27 }
  0x4b   :  { %2381 = vmatprep.subr.bf16.mxu0 %v2638_v3 }
  0x4e   :  { %2383 = vmatpush3.bf16.msra.mxu0 %v3050_v4 }
  0x4f   :  { %2384 = vmatprep.subr.bf16.mxu0 %v2638_v3 }
  0x52   :  { %2386 = vmatpush3.bf16.msra.mxu0 %v3054_v10 }
  0x53   :  { %2507 = vmatprep.subr.bf16.mxu0 %v2638_v3 }
  0xe2   :  { %v134_v39 = vpop.f32.mrb[0].mxu1 }
  0xe3   :  { %v1947_v41 = vpop.f32.mrb[1].mxu1  ;;  %v135_v31 = vadd.f32 %v134_v39, %v54_v63  ;;  %v3334_v39 = vand.u32 4294901760, %v2886_v6  ;;  %v1200_v6 = vand.u32 4294901760, %v42_v0 }
  0xe5   :  { %v2472_v41 = vpack.c.bf16 %v706_v51, %v3334_v39  ;;  %v3184_v51 = vpack.c.bf16 %v1203_v28, %v1200_v6  ;;  %v3204_v22 = vsub.f32 %v42_v0, %v1200_v6 }
 0x108   :  { %v540_v42 = vpop.f32.mrb[0].mxu0 }
 0x109   :  { %v2580_v46 = vadd.f32 %v540_v42, %v135_v31  ;;  %v2002_v43 = vpop.f32.mrb[1].mxu0 }
 0x10b   :  { %v544_v16 = vmax.f32 %v2580_v46, 0.0 }
 0x10d   :  { %v3073_v18 = vand.u32 4294901760, %v544_v16 }
 0x10f   :  { %v631_v19 = vsub.f32 %v544_v16, %v3073_v18  ;;  %2071 = vmatmul.mubr.f32.vlgmr.msra.gmra.mrb[2].mxu1 %v3073_v18 }
 0x110   :  { %2413 = vmatpush3.bf16.msra.mxu1 %v2412_v17  ;;  %2105 = vmatprep.mubr.msk.f32.mxu1 %vm2639_vm0, %v2640_v8 }
 0x111   :  { %v632_v25 = vand.u32 4294901760, %v631_v19  ;;  %2414 = vmatprep.subr.bf16.mxu1 %v2638_v3 }
 0x113   :  { %v633_v26 = vsub.f32 %v631_v19, %v632_v25 }
 0x114   :  { %2416 = vmatpush3.bf16.msra.mxu1 %v2415_v24  ;;  %v1299_v24 = vand.u32 4294901760, %v3220_v55 }
 0x115   :  { %2417 = vmatprep.subr.bf16.mxu1 %v2638_v3  ;;  %v634_v32 = vand.u32 4294901760, %v633_v26 }
 0x117   :  { %2036 = vmatmul.mubr.f32.vlgmr.msra.gmra.mrb[2].mxu0 %v634_v32 }
 0x118   :  { %2419 = vmatpush3.bf16.msra.mxu1 %v2418_v30  ;;  %2229 = vmatprep.mubr.msk.f32.mxu0 %vm2639_vm0, %v2640_v8  ;;  %v1300_v30 = vsub.f32 %v3220_v55, %v1299_v24 }
 0x119   :  { %2420 = vmatprep.subr.bf16.mxu1 %v2638_v3  ;;  %2509 = vmatpush3.bf16.msra.mxu0 %v3184_v51 }
 0x11a   :  { %2510 = vmatprep.subr.bf16.mxu0 %v2638_v3 }
 0x11c   :  { %2422 = vmatpush3.bf16.msra.mxu1 %v2421_v33 }
 0x11d   :  { %2423 = vmatprep.subr.bf16.mxu1 %v2638_v3 }
 0x120   :  { %2425 = vmatpush3.bf16.msra.mxu1 %v2424_v35  ;;  %v1301_v35 = vand.u32 4294901760, %v1300_v30 }
 0x121   :  { %2426 = vmatprep.subr.bf16.mxu1 %v2638_v3 }
 0x124   :  { %2428 = vmatpush3.bf16.msra.mxu1 %v2427_v36 }
 0x125   :  { %2429 = vmatprep.subr.bf16.mxu1 %v2638_v3 }
 0x128   :  { %2431 = vmatpush3.bf16.msra.mxu1 %v2430_v1  ;;  %v2466_v1 = vpack.c.bf16 %v3331_v40, %v3330_v34 }
 0x129   :  { %2432 = vmatprep.subr.bf16.mxu1 %v2638_v3 }
 0x12c   :  { %2434 = vmatpush3.bf16.msra.mxu1 %v2433_v37  ;;  %v3332_v37 = vand.u32 4294901760, %v2839_v9  ;;  %v2481_v9 = vpack.c.bf16 %v748_v49, %v741_v48  ;;  %v49_v48 = vld [vmem:[%s3314_s3 + $0x38] sm:$0xff] }
 0x12d   :  { %2435 = vmatprep.subr.bf16.mxu1 %v2638_v3 }
 0x12e   :  { %v2469_v56 = vpack.c.bf16 %v3333_v54, %v3332_v37 }
 0x12f   :  { %2106 = vmatmul.mubr.f32.vlgmr.msra.gmra.mrb[2].mxu1 %v631_v19 }
 0x130   :  { %2437 = vmatpush3.bf16.msra.mxu1 %v2964_v13  ;;  %2140 = vmatprep.mubr.msk.f32.mxu1 %vm2639_vm0, %v2640_v8 }
 0x131   :  { %2438 = vmatprep.subr.bf16.mxu1 %v2638_v3 }
 0x134   :  { %2440 = vmatpush3.bf16.msra.mxu1 %v2973_v14 }
 0x135   :  { %2441 = vmatprep.subr.bf16.mxu1 %v2638_v3 }
 0x138   :  { %2443 = vmatpush3.bf16.msra.mxu1 %v2983_v12 }
 0x139   :  { %2444 = vmatprep.subr.bf16.mxu1 %v2638_v3 }
 0x13c   :  { %2446 = vmatpush3.bf16.msra.mxu1 %v2991_v15 }
 0x13d   :  { %2447 = vmatprep.subr.bf16.mxu1 %v2638_v3 }
 0x140   :  { %2449 = vmatpush3.bf16.msra.mxu1 %v3037_v59 }
 0x141   :  { %2450 = vmatprep.subr.bf16.mxu1 %v2638_v3 }
 0x144   :  { %2452 = vmatpush3.bf16.msra.mxu1 %v3045_v27 }
 0x145   :  { %2453 = vmatprep.subr.bf16.mxu1 %v2638_v3 }
 0x148   :  { %2455 = vmatpush3.bf16.msra.mxu1 %v3050_v4 }
 0x149   :  { %2456 = vmatprep.subr.bf16.mxu1 %v2638_v3 }
 0x14c   :  { %2458 = vmatpush3.bf16.msra.mxu1 %v3054_v10 }
 0x14d   :  { %2459 = vmatprep.subr.bf16.mxu1 %v2638_v3 }
 0x14f   :  { %2141 = vmatmul.mubr.f32.vlgmr.msra.gmra.mrb[2].mxu1 %v632_v25 }
 0x150   :  { %2461 = vmatpush3.bf16.msra.mxu1 %v2460_v57  ;;  %2175 = vmatprep.mubr.msk.f32.mxu1 %vm2639_vm0, %v2640_v8 }
 0x151   :  { %2462 = vmatprep.subr.bf16.mxu1 %v2638_v3 }
 0x154   :  { %2464 = vmatpush3.bf16.msra.mxu1 %v2463_v5 }
 0x155   :  { %2465 = vmatprep.subr.bf16.mxu1 %v2638_v3 }
 0x158   :  { %2467 = vmatpush3.bf16.msra.mxu1 %v2466_v1 }
 0x159   :  { %2468 = vmatprep.subr.bf16.mxu1 %v2638_v3 }
 0x15c   :  { %2470 = vmatpush3.bf16.msra.mxu1 %v2469_v56 }
 0x15d   :  { %2471 = vmatprep.subr.bf16.mxu1 %v2638_v3 }
 0x160   :  { %2473 = vmatpush3.bf16.msra.mxu1 %v2472_v41 }
 0x161   :  { %2474 = vmatprep.subr.bf16.mxu1 %v2638_v3 }
 0x164   :  { %2476 = vmatpush3.bf16.msra.mxu1 %v2475_v58 }
 0x165   :  { %2477 = vmatprep.subr.bf16.mxu1 %v2638_v3 }
 0x168   :  { %2479 = vmatpush3.bf16.msra.mxu1 %v2478_v2  ;;  %v2532_v2 = vpack.c.bf16 %v3206_v23, %v3204_v22 }
 0x169   :  { %2480 = vmatprep.subr.bf16.mxu1 %v2638_v3 }
 0x16c   :  { %2482 = vmatpush3.bf16.msra.mxu1 %v2481_v9 }
 0x16d   :  { %2483 = vmatprep.subr.bf16.mxu1 %v2638_v3 }
 0x16f   :  { %2176 = vmatmul.mubr.f32.vlgmr.msra.gmra.mrb[2].mxu1 %v3073_v18 }
 0x170   :  { %2485 = vmatpush3.bf16.msra.mxu1 %v2964_v13  ;;  %2210 = vmatprep.mubr.msk.f32.mxu1 %vm2639_vm0, %v2640_v8  ;;  %v1209_v13 = vand.u32 4294901760, %v45_v60 }
 0x171   :  { %2486 = vmatprep.subr.bf16.mxu1 %v2638_v3 }
 0x172   :  { %v3222_v63 = vsub.f32 %v45_v60, %v1209_v13 }
 0x174   :  { %2488 = vmatpush3.bf16.msra.mxu1 %v2973_v14  ;;  %v3194_v14 = vpack.c.bf16 %v1209_v13, %v1206_v29  ;;  %v1306_v25 = vand.u32 4294901760, %v3222_v63  ;;  %v2535_v9 = vpack.c.bf16 %v3222_v63, %v3220_v55  ;;  %v547_v29 = vsub.s32 1, %v3062_v53 }
 0x175   :  { %2489 = vmatprep.subr.bf16.mxu1 %v2638_v3 }
 0x176   :  { %2512 = vmatpush3.bf16.msra.mxu0 %v3194_v14  ;;  %v1307_v32 = vsub.f32 %v3222_v63, %v1306_v25  ;;  %v2559_v28 = vpack.c.bf16 %v1306_v25, %v1299_v24  ;;  %v548_v13 = vrot.slane %v3068_v61, %v547_v29 }
 0x177   :  { %2513 = vmatprep.subr.bf16.mxu0 %v2638_v3 }
 0x178   :  { %2491 = vmatpush3.bf16.msra.mxu1 %v2983_v12  ;;  %v46_v12 = vld [vmem:[%s3314_s3 + $0x20] sm:$0xff]  ;;  %v1308_v36 = vand.u32 4294901760, %v1307_v32 }
 0x179   :  { %2492 = vmatprep.subr.bf16.mxu1 %v2638_v3  ;;  %v1212_v20 = vand.u32 4294901760, %v46_v12 }
 0x17a   :  { %v2523_v57 = vpack.c.bf16 %v1308_v36, %v1301_v35 }
 0x17b   :  { %v3224_v31 = vsub.f32 %v46_v12, %v1212_v20 }
 0x17c   :  { %2494 = vmatpush3.bf16.msra.mxu1 %v2991_v15  ;;  %v47_v15 = vld [vmem:[%s3314_s3 + $0x28] sm:$0xff]  ;;  %s2641_s3 = smov [#allocation2]  }
 0x17d   :  { %2495 = vmatprep.subr.bf16.mxu1 %v2638_v3  ;;  %v1215_v21 = vand.u32 4294901760, %v47_v15  ;;  %v1313_v44 = vand.u32 4294901760, %v3224_v31  ;;  %s1743_s22 = sshll.u32 %s2641_s3, 4  ;;  %s1744_s22 = int_to_ptr.vmem [resolvable:$true] %s1743_s22 }
 0x17e   :  { %s2614_s23 = scalar_lea.vmem %s1744_s22, 128  ;;  %p2619_p1 = scmp.lt.s32.totalorder %s1744_s22, %s1744_s22 }
 0x17f   :  { %v3208_v45 = vpack.c.bf16 %v1215_v21, %v1212_v20  ;;  %v3226_v42 = vsub.f32 %v47_v15, %v1215_v21  ;;  %v1314_v62 = vsub.f32 %v3224_v31, %v1313_v44  ;;  %p2615_p0 = scmp.ne.s32.totalorder %s1744_s22, %s2614_s23  ;;  %p2620_p2 = scmp.lt.s32.totalorder %s2614_s23, %s2614_s23 }
 0x180   :  { %2497 = vmatpush3.bf16.msra.mxu1 %v3037_v59  ;;  %v1218_v59 = vand.u32 4294901760, %v48_v47 }
 0x181   :  { %2498 = vmatprep.subr.bf16.mxu1 %v2638_v3  ;;  %2515 = vmatpush3.bf16.msra.mxu0 %v3208_v45  ;;  %v1320_v50 = vand.u32 4294901760, %v3226_v42  ;;  %v1315_v5 = vand.u32 4294901760, %v1314_v62  ;;  %v2538_v0 = vpack.c.bf16 %v3226_v42, %v3224_v31  ;;  %p2621_p3 = por %p2620_p2, %p2619_p1 }
 0x182   :  { %2516 = vmatprep.subr.bf16.mxu0 %v2638_v3  ;;  %v3230_v43 = vsub.f32 %v48_v47, %v1218_v59 }
 0x183   :  { %v1321_v7 = vsub.f32 %v3226_v42, %v1320_v50  ;;  %v2562_v11 = vpack.c.bf16 %v1320_v50, %v1313_v44  ;;  %p2622_p4 = pnand %p2621_p3, %p2615_p0 }
 0x184   :  { %2500 = vmatpush3.bf16.msra.mxu1 %v3045_v27  ;;  %v1221_v27 = vand.u32 4294901760, %v49_v48  ;;  %v1327_v40 = vand.u32 4294901760, %v3230_v43 }
 0x185   :  { %2501 = vmatprep.subr.bf16.mxu1 %v2638_v3  ;;  %v1322_v34 = vand.u32 4294901760, %v1321_v7 }
 0x186   :  { %v3228_v46 = vpack.c.bf16 %v1221_v27, %v1218_v59  ;;  %v3232_v16 = vsub.f32 %v49_v48, %v1221_v27  ;;  %v1328_v54 = vsub.f32 %v3230_v43, %v1327_v40 }
 0x187   :  { %v2526_v37 = vpack.c.bf16 %v1322_v34, %v1315_v5 }
 0x188   :  { %2503 = vmatpush3.bf16.msra.mxu1 %v3050_v4  ;;  %v1285_v4 = vand.u32 4294901760, %v3204_v22  ;;  %2518 = vmatpush3.bf16.msra.mxu0 %v3228_v46  ;;  %v1334_v1 = vand.u32 4294901760, %v3232_v16  ;;  %v1329_v39 = vand.u32 4294901760, %v1328_v54  ;;  %v2541_v38 = vpack.c.bf16 %v3232_v16, %v3230_v43 }
 0x189   :  { %2504 = vmatprep.subr.bf16.mxu1 %v2638_v3  ;;  %2519 = vmatprep.subr.bf16.mxu0 %v2638_v3 }
 0x18a   :  { %v1286_v17 = vsub.f32 %v3204_v22, %v1285_v4  ;;  %v1335_v56 = vsub.f32 %v3232_v16, %v1334_v1  ;;  %v2565_v60 = vpack.c.bf16 %v1334_v1, %v1327_v40 }
 0x18c   :  { %2506 = vmatpush3.bf16.msra.mxu1 %v3054_v10  ;;  %v1292_v10 = vand.u32 4294901760, %v3206_v23  ;;  %v1287_v19 = vand.u32 4294901760, %v1286_v17  ;;  %v1336_v41 = vand.u32 4294901760, %v1335_v56 }
 0x18e   :  { %v2529_v58 = vpack.c.bf16 %v1336_v41, %v1329_v39  ;;  %v2556_v6 = vpack.c.bf16 %v1292_v10, %v1285_v4 }
 0x18f   :  { %2211 = vmatmul.mubr.f32.vlgmr.msra.gmra.mrb[2].mxu1 %v3073_v18  ;;  %v1293_v18 = vsub.f32 %v3206_v23, %v1292_v10 }
 0x191   :  { %v1294_v26 = vand.u32 4294901760, %v1293_v18 }
 0x193   :  { %v2520_v33 = vpack.c.bf16 %v1294_v26, %v1287_v19 }
 0x1ea   :  { %v636_v49 = vpop.f32.mrb[2].mxu0 }
 0x1eb   :  { %v2037_v52 = vpop.f32.mrb[3].mxu0  ;;  %v637_v12 = vadd.f32 %v636_v49, %v548_v13  ;;  %v1193_v49 = vsub.s32 2, %v3062_v53 }
 0x262   :  { %v1186_v15 = vpop.f32.mrb[2].mxu1 }
 0x263   :  { %v2582_v20 = vadd.f32 %v1186_v15, %v637_v12  ;;  %v2212_v21 = vpop.f32.mrb[3].mxu1 }
 0x265   :  { %v1190_v22 = vmax.f32 %v2582_v20, 0.0 }
 0x267   :  { %v1197_v23 = vsel %vm1195_vm2, %v1190_v22, 0 }
 0x268   :  { %v1272_v47 = vand.u32 4294901760, %v1197_v23 }
 0x26a   :  { %v1273_v48 = vsub.f32 %v1197_v23, %v1272_v47 }
 0x26c   :  { %v1274_v59 = vand.u32 4294901760, %v1273_v48 }
 0x26e   :  { %v1275_v27 = vsub.f32 %v1273_v48, %v1274_v59 }
 0x270   :  { %v1276_v52 = vand.u32 4294901760, %v1275_v27 }
 0x272   :  { %2230 = vmatmul.mubr.f32.vlgmr.msra.gmra.mrb[4].mxu0 %v1276_v52 }
 0x273   :  { %2521 = vmatpush3.bf16.msra.mxu0 %v2520_v33  ;;  %2248 = vmatprep.mubr.msk.f32.mxu0 %vm2639_vm0, %v2640_v8 }
 0x274   :  { %2522 = vmatprep.subr.bf16.mxu0 %v2638_v3 }
 0x277   :  { %2524 = vmatpush3.bf16.msra.mxu0 %v2523_v57 }
 0x278   :  { %2525 = vmatprep.subr.bf16.mxu0 %v2638_v3 }
 0x27b   :  { %2527 = vmatpush3.bf16.msra.mxu0 %v2526_v37 }
 0x27c   :  { %2528 = vmatprep.subr.bf16.mxu0 %v2638_v3 }
 0x27f   :  { %2530 = vmatpush3.bf16.msra.mxu0 %v2529_v58 }
 0x280   :  { %2531 = vmatprep.subr.bf16.mxu0 %v2638_v3 }
 0x282   :  { %2249 = vmatmul.mubr.f32.vlgmr.msra.gmra.mrb[4].mxu0 %v1272_v47 }
 0x283   :  { %2533 = vmatpush3.bf16.msra.mxu0 %v2532_v2  ;;  %2267 = vmatprep.mubr.msk.f32.mxu0 %vm2639_vm0, %v2640_v8 }
 0x284   :  { %2534 = vmatprep.subr.bf16.mxu0 %v2638_v3 }
 0x287   :  { %2536 = vmatpush3.bf16.msra.mxu0 %v2535_v9 }
 0x288   :  { %2537 = vmatprep.subr.bf16.mxu0 %v2638_v3 }
 0x28b   :  { %2539 = vmatpush3.bf16.msra.mxu0 %v2538_v0 }
 0x28c   :  { %2540 = vmatprep.subr.bf16.mxu0 %v2638_v3 }
 0x28f   :  { %2542 = vmatpush3.bf16.msra.mxu0 %v2541_v38 }
 0x290   :  { %2543 = vmatprep.subr.bf16.mxu0 %v2638_v3 }
 0x292   :  { %2268 = vmatmul.mubr.f32.vlgmr.msra.gmra.mrb[4].mxu0 %v1273_v48 }
 0x293   :  { %2545 = vmatpush3.bf16.msra.mxu0 %v3184_v51  ;;  %2286 = vmatprep.mubr.msk.f32.mxu0 %vm2639_vm0, %v2640_v8 }
 0x294   :  { %2546 = vmatprep.subr.bf16.mxu0 %v2638_v3 }
 0x297   :  { %2548 = vmatpush3.bf16.msra.mxu0 %v3194_v14 }
 0x298   :  { %2549 = vmatprep.subr.bf16.mxu0 %v2638_v3 }
 0x29b   :  { %2551 = vmatpush3.bf16.msra.mxu0 %v3208_v45 }
 0x29c   :  { %2552 = vmatprep.subr.bf16.mxu0 %v2638_v3 }
 0x29f   :  { %2554 = vmatpush3.bf16.msra.mxu0 %v3228_v46 }
 0x2a0   :  { %2555 = vmatprep.subr.bf16.mxu0 %v2638_v3 }
 0x2a2   :  { %2287 = vmatmul.mubr.f32.vlgmr.msra.gmra.mrb[4].mxu0 %v1274_v59 }
 0x2a3   :  { %2557 = vmatpush3.bf16.msra.mxu0 %v2556_v6  ;;  %2305 = vmatprep.mubr.msk.f32.mxu0 %vm2639_vm0, %v2640_v8 }
 0x2a4   :  { %2558 = vmatprep.subr.bf16.mxu0 %v2638_v3 }
 0x2a7   :  { %2560 = vmatpush3.bf16.msra.mxu0 %v2559_v28 }
 0x2a8   :  { %2561 = vmatprep.subr.bf16.mxu0 %v2638_v3 }
 0x2ab   :  { %2563 = vmatpush3.bf16.msra.mxu0 %v2562_v11 }
 0x2ac   :  { %2564 = vmatprep.subr.bf16.mxu0 %v2638_v3 }
 0x2af   :  { %2566 = vmatpush3.bf16.msra.mxu0 %v2565_v60 }
 0x2b0   :  { %2567 = vmatprep.subr.bf16.mxu0 %v2638_v3 }
 0x2b2   :  { %2306 = vmatmul.mubr.f32.vlgmr.msra.gmra.mrb[4].mxu0 %v1272_v47 }
 0x2b3   :  { %2569 = vmatpush3.bf16.msra.mxu0 %v3184_v51  ;;  %2324 = vmatprep.mubr.msk.f32.mxu0 %vm2639_vm0, %v2640_v8  ;;  %v1194_v51 = vrot.slane %v3068_v61, %v1193_v49 }
 0x2b4   :  { %2570 = vmatprep.subr.bf16.mxu0 %v2638_v3 }
 0x2b7   :  { %2572 = vmatpush3.bf16.msra.mxu0 %v3194_v14 }
 0x2b8   :  { %2573 = vmatprep.subr.bf16.mxu0 %v2638_v3 }
 0x2bb   :  { %2575 = vmatpush3.bf16.msra.mxu0 %v3208_v45 }
 0x2bc   :  { %2576 = vmatprep.subr.bf16.mxu0 %v2638_v3 }
 0x2bf   :  { %2578 = vmatpush3.bf16.msra.mxu0 %v3228_v46 }
 0x2c2   :  { %2325 = vmatmul.mubr.f32.vlgmr.msra.gmra.mrb[4].mxu0 %v1272_v47 }
 0x395   :  { %v1732_v8 = vpop.f32.mrb[4].mxu0 }
 0x396   :  { %v2583_v4 = vadd.f32 %v1732_v8, %v1194_v51  ;;  %v2326_v10 = vpop.f32.mrb[5].mxu0 }
 0x398   :  { %1736 = vst [vmem:[#allocation2] sm:$0xff] %v2583_v4 }
 0x399   :  { %2625 = shalt.err (!%p2622_p4)
}
 0x39a   :  { %s2626_s26 = scalar_lea.hbm %s3316_s5, 128 }
 0x39b   :  { %p2627_p5 = scmp.ne.s32.totalorder %s3316_s5, %s2626_s26  ;;  %p2630_p6 = scmp.lt.u32.totalorder %s2626_s26, %s3316_s5 }
 0x39d   :  { %p2632_p7 = pnand %p2630_p6, %p2627_p5 }
 0x39f   :  { %2635 = shalt.err (!%p2632_p7)
}
 0x3a0   :  { %1746 = dma.vmem_to_hbm [thread:$0]  %s1744_s22, 128, %s3316_s5, [#allocation3]  }
 0x3a1   :  { %2636 = dma.done.wait [#allocation3], 128  }
 0x3a2   :  { %2637 = vsyncadd [#allocation3], 4294967168 }
 0x3a3   :  { %1750 = vsyncpa [#allocation3], 1 }

</bundles_post_ra>
